<compile_context>
chip_gen: v7x
topology: tpu7x:2x2x1
jax: 0.10.0
libtpu: 0.0.40
codegen_flags: <defaults>
</compile_context>

<pallas_src>
import collections
import functools

import jax
import jax.numpy as jnp
from jax import lax
from jax.experimental import pallas as pl
from jax.experimental.pallas import tpu as pltpu


LayerCfg = collections.namedtuple("LayerCfg", ["Ci", "Co", "k", "d", "P", "has_ds"])


def _round_up(v, m):
    return -(-v // m) * m


def _vmem_capacity_bytes():
    """Physical VMEM per TensorCore; conservative 64 MiB default if unknown."""
    try:
        info = pltpu.get_tpu_info()
        cap = getattr(info, "vmem_capacity_bytes", None)
        if cap:
            return int(cap)
    except Exception:
        pass
    return 64 * 1024 * 1024


# ------------------------------- fused kernel ---------------------------------

def _tcn_group_kernel(*refs, cfgs, TL, use_halo):
    """A group of consecutive TemporalBlocks for one (batch, time-tile) step.

    Refs (in order):
      x        : (1, Ci0, TL) bf16             input tile of the first layer
      per layer: w1 (Co, k*Ci) bf16, b (Co, 3) f32 [b1|b2|bd], w2 (Co, k*Co) bf16,
                 [wd (Co, Ci) bf16 if downsample]
      out      : (1, Co_last, TL) bf16
      scratch  : per layer with P > 0 (only when use_halo):
                 x_halo (Ci, P) bf16, h_halo (Co, P) bf16   (persistent, carried
                 along the sequential time axis; re-zeroed at j == 0)
    """
    it = iter(refs)
    x_ref = next(it)
    wrefs = []
    for c in cfgs:
        w1 = next(it)
        b = next(it)
        w2 = next(it)
        wd = next(it) if c.has_ds else None
        wrefs.append((w1, b, w2, wd))
    out_ref = next(it)
    halo_refs = []
    for c in cfgs:
        if use_halo and c.P > 0:
            halo_refs.append((next(it), next(it)))
        else:
            halo_refs.append((None, None))

    # Zero the carried halos at the start of every batch element's time sweep.
    if any(xr is not None for xr, _ in halo_refs):
        @pl.when(pl.program_id(1) == 0)
        def _init():
            for xr, hr in halo_refs:
                if xr is not None:
                    xr[...] = jnp.zeros_like(xr)
                    hr[...] = jnp.zeros_like(hr)

    cur = x_ref[0]                                            # (Ci0, TL) bf16
    for c, (w1_ref, b_ref, w2_ref, wd_ref), (xh_ref, hh_ref) in zip(
            cfgs, wrefs, halo_refs):
        k, d, P = c.k, c.d, c.P
        b1 = b_ref[:, 0:1]
        b2 = b_ref[:, 1:2]

        # ---- conv1: k taps fused into ONE matmul, contraction K = k*Ci ------
        if P > 0:
            xh = xh_ref[...] if xh_ref is not None else jnp.zeros((c.Ci, P), cur.dtype)
            xwin = jnp.concatenate([xh, cur], axis=-1)        # (Ci, TL + P)
        else:
            xwin = cur
        if k > 1:
            xs = jnp.concatenate([xwin[:, i * d:i * d + TL] for i in range(k)],
                                 axis=0)                      # (k*Ci, TL)
        else:
            xs = xwin
        acc1 = jnp.dot(w1_ref[...], xs, preferred_element_type=jnp.float32) + b1
        hb = jnp.maximum(acc1, 0.0).astype(jnp.bfloat16)      # (Co, TL)
        # Dropout = identity (eval mode).

        # ---- conv2: k taps fused into ONE matmul, contraction K = k*Co ------
        if P > 0:
            hh = hh_ref[...] if hh_ref is not None else jnp.zeros((c.Co, P), hb.dtype)
            hwin = jnp.concatenate([hh, hb], axis=-1)         # (Co, TL + P)
        else:
            hwin = hb
        if k > 1:
            hs = jnp.concatenate([hwin[:, i * d:i * d + TL] for i in range(k)],
                                 axis=0)                      # (k*Co, TL)
        else:
            hs = hwin
        acc2 = jnp.dot(w2_ref[...], hs, preferred_element_type=jnp.float32) + b2
        out = jnp.maximum(acc2, 0.0)                          # (Co, TL) f32

        # ---- residual + final ReLU (f32) ------------------------------------
        if wd_ref is not None:
            res = jnp.dot(wd_ref[...], cur,
                          preferred_element_type=jnp.float32) + b_ref[:, 2:3]
        else:
            res = cur.astype(jnp.float32)

        # ---- carry the halos for the next time tile (read-before-write ok) --
        if xh_ref is not None:
            xh_ref[...] = cur[:, TL - P:]
            hh_ref[...] = hb[:, TL - P:]

        cur = jnp.maximum(out + res, 0.0).astype(jnp.bfloat16)

    out_ref[0] = cur


# --------------------------- planning (VMEM / tiling) --------------------------

def _layer_io_weights_bytes(c):
    bf = 2
    w = 2 * (c.Co * c.k * c.Ci * bf + c.Co * c.k * c.Co * bf
             + (c.Co * c.Ci * bf if c.has_ds else 0)
             + c.Co * 128 * 4)                       # (Co,3) bias lane-pads to 128
    halo = (c.Ci + c.Co) * _round_up(max(c.P, 1), 128) * bf if c.P > 0 else 0
    return w + halo


def _layer_intermediate_bytes(c, TL):
    bf = 2
    P = c.P
    return (c.Ci * (TL + P) * bf            # xwin
            + c.k * c.Ci * TL * bf          # xs staging
            + c.Co * TL * 4                 # acc1
            + c.Co * (TL + P) * bf          # hwin (hb folded)
            + c.k * c.Co * TL * bf          # hs staging
            + 2 * c.Co * TL * 4             # acc2 + residual
            + 2 * c.Co * TL * bf)           # hb + block output


def _group_vmem_estimate(cfgs, TL):
    bf = 2
    io = 2 * cfgs[0].Ci * TL * bf + 2 * cfgs[-1].Co * TL * bf     # double-buffered
    tot = io + sum(_layer_io_weights_bytes(c) for c in cfgs)
    tot += max(_layer_intermediate_bytes(c, TL) for c in cfgs)
    tot += max(c.Co for c in cfgs) * TL * bf                      # carried `cur`
    return tot


def _choose_time_tile(L_pad, cfgs, budget):
    """Largest lane-dense time tile such that (at least) single-layer groups fit."""
    max_P = max(c.P for c in cfgs)

    def per_layer_fits(TL):
        return all(_group_vmem_estimate([c], TL) <= budget for c in cfgs)

    if per_layer_fits(L_pad):
        return L_pad                       # whole (padded) sequence in one tile
    for cand in (4096, 2048, 1024, 512, 256, 128):
        if cand < L_pad and L_pad % cand == 0 and cand >= max_P and per_layer_fits(cand):
            return cand
    return L_pad                           # best effort fallback


def _group_layers(cfgs, TL, budget, max_group_layers=None):
    """Greedy fusion of consecutive layers while the VMEM estimate fits."""
    groups = []
    start = 0
    for i in range(1, len(cfgs)):
        too_big = _group_vmem_estimate(cfgs[start:i + 1], TL) > budget
        too_long = (max_group_layers is not None) and (i - start) >= max_group_layers
        if too_big or too_long:
            groups.append((start, i))
            start = i
    groups.append((start, len(cfgs)))
    return groups


# ------------------------------ pallas_call wrapper ----------------------------

def _run_group(x, params, cfgs, TL, nL, vmem_limit):
    """Run one fused group of TemporalBlocks. x: (N, Ci0, L_pad) bf16."""
    N, _, L_pad = x.shape
    Co_last = cfgs[-1].Co
    use_halo = nL > 1

    in_specs = [pl.BlockSpec((1, cfgs[0].Ci, TL), lambda n, j: (n, 0, j))]
    operands = [x]
    for p, c in zip(params, cfgs):
        in_specs.append(pl.BlockSpec(p["w1"].shape, lambda n, j: (0, 0)))
        in_specs.append(pl.BlockSpec(p["b"].shape, lambda n, j: (0, 0)))
        in_specs.append(pl.BlockSpec(p["w2"].shape, lambda n, j: (0, 0)))
        operands += [p["w1"], p["b"], p["w2"]]
        if c.has_ds:
            in_specs.append(pl.BlockSpec(p["wd"].shape, lambda n, j: (0, 0)))
            operands.append(p["wd"])

    scratch_shapes = []
    if use_halo:
        for c in cfgs:
            if c.P > 0:
                scratch_shapes.append(pltpu.VMEM((c.Ci, c.P), jnp.bfloat16))
                scratch_shapes.append(pltpu.VMEM((c.Co, c.P), jnp.bfloat16))

    kernel = functools.partial(_tcn_group_kernel, cfgs=tuple(cfgs), TL=TL,
                               use_halo=use_halo)

    grid_spec = pltpu.PrefetchScalarGridSpec(
        num_scalar_prefetch=0,
        grid=(N, nL),
        in_specs=in_specs,
        out_specs=pl.BlockSpec((1, Co_last, TL), lambda n, j: (n, 0, j)),
        scratch_shapes=scratch_shapes,
    )

    # TODO(synk): when N == 1 and nL > 1, only one TensorCore is used on v7x
    # (time axis is "arbitrary" due to the halo carry); a manual-DMA halo variant
    # would keep both grid axes parallel.
    return pl.pallas_call(
        kernel,
        out_shape=jax.ShapeDtypeStruct((N, Co_last, L_pad), jnp.bfloat16),
        grid_spec=grid_spec,
        compiler_params=pltpu.CompilerParams(
            dimension_semantics=("parallel", "arbitrary"),
            vmem_limit_bytes=vmem_limit),
    )(*operands)


def temporal_conv_net(x, packed_params, *, kernel_size=2, time_tile=None,
                      max_group_layers=None):
    """Stack of TemporalBlocks; block i uses dilation 2**i. Returns f32 (N, C_last, L)."""
    assert packed_params, "need at least one TemporalBlock"
    N, C_in, L = x.shape
    x = x.astype(jnp.bfloat16)

    # Static per-layer configuration.
    cfgs = []
    in_ch = C_in
    for i, p in enumerate(packed_params):
        Co, kci = p["w1"].shape
        k = kernel_size
        Ci = kci // k
        assert Ci == in_ch, (Ci, in_ch)
        d = 2 ** i
        cfgs.append(LayerCfg(Ci=Ci, Co=Co, k=k, d=d, P=(k - 1) * d,
                             has_ds=p["wd"] is not None))
        in_ch = Co

    # Lane-dense time axis: pad L up to a multiple of 128; causal convs keep the
    # first L outputs exact, the padded tail is sliced off at the end.
    L_pad = max(_round_up(L, 128), 128)
    if L_pad != L:
        x = jnp.pad(x, ((0, 0), (0, 0), (0, L_pad - L)))

    # Generation-aware VMEM budgets (64 MiB/TC on v7x vs 128 MiB on v5e/v6e).
    cap = _vmem_capacity_bytes()
    plan_budget = max(8 << 20, int(cap * 0.30))
    vmem_limit = max(plan_budget + (8 << 20), int(cap * 0.60))

    max_P = max(c.P for c in cfgs)
    if time_tile is None:
        TL = _choose_time_tile(L_pad, cfgs, plan_budget)
    else:
        TL = int(time_tile)
        assert TL % 128 == 0 and L_pad % TL == 0, (TL, L_pad)
    nL = L_pad // TL
    if nL > 1:
        assert max_P <= TL, ("halo wider than time tile", max_P, TL)

    groups = _group_layers(cfgs, TL, plan_budget, max_group_layers)
    for (s, e) in groups:
        x = _run_group(x, packed_params[s:e], cfgs[s:e], TL, nL, vmem_limit)

    return x[:, :, :L].astype(jnp.float32)


# --------------------------- parameter setup (glue) ---------------------------

def _weight_norm_effective(key, shape):
    """nn.utils.weight_norm forward: w = g * v/||v|| with g initialized to ||v||,
    so the effective weight at init equals v (~ N(0, 0.01) per init_weights())."""
    v = 0.01 * jax.random.normal(key, shape, jnp.float32)
    norm = jnp.sqrt(jnp.sum(v * v, axis=(1, 2), keepdims=True))
    g = norm
    return g * v / norm


def init_params(key, num_inputs, num_channels, kernel_size=2):
    """Raw f32 params in PyTorch layout: conv weights (C_out, C_in, k)."""
    params = []
    in_ch = num_inputs
    for out_ch in num_channels:
        key, k1, k2, k3, k4, k5, k6 = jax.random.split(key, 7)
        p = {
            "w1": _weight_norm_effective(k1, (out_ch, in_ch, kernel_size)),
            "b1": 0.01 * jax.random.normal(k2, (out_ch,), jnp.float32),
            "w2": _weight_norm_effective(k3, (out_ch, out_ch, kernel_size)),
            "b2": 0.01 * jax.random.normal(k4, (out_ch,), jnp.float32),
        }
        if in_ch != out_ch:
            p["wd"] = 0.01 * jax.random.normal(k5, (out_ch, in_ch), jnp.float32)
            p["bd"] = 0.01 * jax.random.normal(k6, (out_ch,), jnp.float32)
        else:
            p["wd"] = None
            p["bd"] = None
        params.append(p)
        in_ch = out_ch
    return params


def pack_params(raw_params, kernel_size=2):
    """Kernel-ready params: taps stacked along the contraction dim (bf16 weights),
    the three biases packed into one (C_out, 3) f32 slab [b1 | b2 | bd]."""
    packed = []
    for p in raw_params:
        C_out, C_in, k = p["w1"].shape
        assert k == kernel_size
        w1 = jnp.transpose(p["w1"], (0, 2, 1)).reshape(C_out, k * C_in)
        w2 = jnp.transpose(p["w2"], (0, 2, 1)).reshape(C_out, k * C_out)
        bd = p["bd"] if p["bd"] is not None else jnp.zeros((C_out,), jnp.float32)
        b = jnp.stack([p["b1"], p["b2"], bd], axis=1).astype(jnp.float32)
        packed.append({
            "w1": w1.astype(jnp.bfloat16),
            "b": b,
            "w2": w2.astype(jnp.bfloat16),
            "wd": None if p["wd"] is None else p["wd"].astype(jnp.bfloat16),
        })
    return packed


# ------------------------------ pure-JAX reference -----------------------------

def _ref_forward(x, raw_params, kernel_size=2):
    """Reference TCN forward mirroring the kernel's bf16 quantization points
    (weights, layer inputs, conv2 input) with f32 accumulation everywhere."""
    q = lambda a: a.astype(jnp.bfloat16).astype(jnp.float32)

    def causal_conv(h, w_oik, b, d):
        P = (kernel_size - 1) * d
        y = lax.conv_general_dilated(
            h, w_oik, window_strides=(1,), padding=[(P, P)],
            rhs_dilation=(d,), dimension_numbers=("NCH", "OIH", "NCH"))
        y = y[:, :, :h.shape[2]]                      # Chomp1d
        return y + b[None, :, None]

    x = q(x)
    for i, p in enumerate(raw_params):
        d = 2 ** i
        h = q(jnp.maximum(causal_conv(x, q(p["w1"]), p["b1"], d), 0.0))
        out = jnp.maximum(causal_conv(h, q(p["w2"]), p["b2"], d), 0.0)
        if p["wd"] is not None:
            res = jnp.einsum("oi,nil->nol", q(p["wd"]), x) + p["bd"][None, :, None]
        else:
            res = x
        x = q(jnp.maximum(out + res, 0.0))
    return x


if __name__ == "__main__":
    key = jax.random.PRNGKey(0)
    kx, kp, kx2, kp2 = jax.random.split(key, 4)

    # --- small test: fully fused (single group, single time tile) -------------
    N, C_in, L = 2, 4, 16
    num_channels = [8, 8]
    ksize = 2

    x = jax.random.normal(kx, (N, C_in, L), jnp.float32)
    raw = init_params(kp, C_in, num_channels, kernel_size=ksize)
    packed = pack_params(raw, kernel_size=ksize)

    y = jax.block_until_ready(temporal_conv_net(x, packed, kernel_size=ksize))
    assert y.shape == (N, num_channels[-1], L), y.shape

    y_ref = _ref_forward(x, raw, kernel_size=ksize)
    err = float(jnp.max(jnp.abs(y - y_ref)))
    assert jnp.allclose(y, y_ref, rtol=1e-3, atol=1e-4), err

    # --- larger test: time-tiled halo-carry path + multi-group path ------------
    N2, C_in2, L2 = 2, 16, 256
    num_channels2 = [32, 32, 32]
    ksize2 = 3

    x2 = jax.random.normal(kx2, (N2, C_in2, L2), jnp.float32)
    raw2 = init_params(kp2, C_in2, num_channels2, kernel_size=ksize2)
    packed2 = pack_params(raw2, kernel_size=ksize2)

    y2 = jax.block_until_ready(
        temporal_conv_net(x2, packed2, kernel_size=ksize2,
                          time_tile=128, max_group_layers=2))
    assert y2.shape == (N2, num_channels2[-1], L2), y2.shape

    y2_ref = _ref_forward(x2, raw2, kernel_size=ksize2)
    err2 = float(jnp.max(jnp.abs(y2 - y2_ref)))
    assert jnp.allclose(y2, y2_ref, rtol=1e-3, atol=1e-4), err2

    print("KERNEL_OK")
</pallas_src>

<mosaic_0001>
module attributes {stable_mosaic.version = 11 : i64} {
  func.func @_tcn_group_kernel(%arg0: i32, %arg1: i32, %arg2: memref<1x4x128xbf16, #tpu.memory_space<vmem>>, %arg3: memref<8x8xbf16, #tpu.memory_space<vmem>>, %arg4: memref<8x3xf32, #tpu.memory_space<vmem>>, %arg5: memref<8x16xbf16, #tpu.memory_space<vmem>>, %arg6: memref<8x4xbf16, #tpu.memory_space<vmem>>, %arg7: memref<8x16xbf16, #tpu.memory_space<vmem>>, %arg8: memref<8x3xf32, #tpu.memory_space<vmem>>, %arg9: memref<8x16xbf16, #tpu.memory_space<vmem>>, %arg10: memref<1x8x128xbf16, #tpu.memory_space<vmem>>) attributes {dimension_semantics = [#tpu.dimension_semantics<parallel>, #tpu.dimension_semantics<arbitrary>], iteration_bounds = array<i64: 2, 1>, scalar_prefetch = 0 : i64, scratch_operands = 0 : i64, tpu.core_type = #tpu.core_type<tc>, window_params = [{transform_indices = @transform_0, window_bounds = array<i64: 1, 4, 128>}, {pipeline_mode = #tpu.pipeline_mode<synchronous>, transform_indices = @transform_1, window_bounds = array<i64: 8, 8>}, {pipeline_mode = #tpu.pipeline_mode<synchronous>, transform_indices = @transform_2, window_bounds = array<i64: 8, 3>}, {pipeline_mode = #tpu.pipeline_mode<synchronous>, transform_indices = @transform_3, window_bounds = array<i64: 8, 16>}, {pipeline_mode = #tpu.pipeline_mode<synchronous>, transform_indices = @transform_4, window_bounds = array<i64: 8, 4>}, {pipeline_mode = #tpu.pipeline_mode<synchronous>, transform_indices = @transform_5, window_bounds = array<i64: 8, 16>}, {pipeline_mode = #tpu.pipeline_mode<synchronous>, transform_indices = @transform_6, window_bounds = array<i64: 8, 3>}, {pipeline_mode = #tpu.pipeline_mode<synchronous>, transform_indices = @transform_7, window_bounds = array<i64: 8, 16>}, {transform_indices = @transform_8, window_bounds = array<i64: 1, 8, 128>}]} {
    %c0 = arith.constant 0 : index
    %c0_0 = arith.constant 0 : index
    %c0_1 = arith.constant 0 : index
    %0 = vector.load %arg2[%c0, %c0_0, %c0_1] : memref<1x4x128xbf16, #tpu.memory_space<vmem>>, vector<1x4x128xbf16>
    %1 = vector.shape_cast %0 : vector<1x4x128xbf16> to vector<4x128xbf16>
    %c0_2 = arith.constant 0 : index
    %c0_3 = arith.constant 0 : index
    %2 = vector.load %arg4[%c0_2, %c0_3] : memref<8x3xf32, #tpu.memory_space<vmem>>, vector<8x1xf32>
    %c0_4 = arith.constant 0 : index
    %c1 = arith.constant 1 : index
    %3 = vector.load %arg4[%c0_4, %c1] : memref<8x3xf32, #tpu.memory_space<vmem>>, vector<8x1xf32>
    %cst = arith.constant 0.000000e+00 : bf16
    %4 = vector.broadcast %cst : bf16 to vector<4x1xbf16>
    %5 = tpu.concatenate %4, %1 in 1 : vector<4x1xbf16>, vector<4x128xbf16> -> vector<4x129xbf16>
    %6 = vector.extract_strided_slice %5 {offsets = [0, 0], sizes = [4, 128], strides = [1, 1]} : vector<4x129xbf16> to vector<4x128xbf16>
    %7 = vector.extract_strided_slice %5 {offsets = [0, 1], sizes = [4, 128], strides = [1, 1]} : vector<4x129xbf16> to vector<4x128xbf16>
    %8 = tpu.concatenate %6, %7 in 0 : vector<4x128xbf16>, vector<4x128xbf16> -> vector<8x128xbf16>
    %c0_5 = arith.constant 0 : index
    %c0_6 = arith.constant 0 : index
    %9 = vector.load %arg3[%c0_5, %c0_6] : memref<8x8xbf16, #tpu.memory_space<vmem>>, vector<8x8xbf16>
    %cst_7 = arith.constant dense<0.000000e+00> : vector<8x128xf32>
    %10 = tpu.matmul %9, %8, %cst_7 {dimension_numbers = #tpu.dot_dimension_numbers<[1], [0], [0], [1], [0, 0, 1, 1], [], []>} : vector<8x8xbf16>, vector<8x128xbf16>, vector<8x128xf32> -> vector<8x128xf32>
    %11 = vector.broadcast %2 : vector<8x1xf32> to vector<8x128xf32>
    %12 = arith.addf %10, %11 : vector<8x128xf32>
    %cst_8 = arith.constant 0.000000e+00 : f32
    %13 = vector.broadcast %cst_8 : f32 to vector<8x128xf32>
    %14 = arith.maximumf %12, %13 : vector<8x128xf32>
    %15 = arith.truncf %14 : vector<8x128xf32> to vector<8x128xbf16>
    %cst_9 = arith.constant 0.000000e+00 : bf16
    %16 = vector.broadcast %cst_9 : bf16 to vector<8x1xbf16>
    %17 = tpu.concatenate %16, %15 in 1 : vector<8x1xbf16>, vector<8x128xbf16> -> vector<8x129xbf16>
    %18 = vector.extract_strided_slice %17 {offsets = [0, 0], sizes = [8, 128], strides = [1, 1]} : vector<8x129xbf16> to vector<8x128xbf16>
    %19 = vector.extract_strided_slice %17 {offsets = [0, 1], sizes = [8, 128], strides = [1, 1]} : vector<8x129xbf16> to vector<8x128xbf16>
    %20 = tpu.concatenate %18, %19 in 0 : vector<8x128xbf16>, vector<8x128xbf16> -> vector<16x128xbf16>
    %c0_10 = arith.constant 0 : index
    %c0_11 = arith.constant 0 : index
    %21 = vector.load %arg5[%c0_10, %c0_11] : memref<8x16xbf16, #tpu.memory_space<vmem>>, vector<8x16xbf16>
    %cst_12 = arith.constant dense<0.000000e+00> : vector<8x128xf32>
    %22 = tpu.matmul %21, %20, %cst_12 {dimension_numbers = #tpu.dot_dimension_numbers<[1], [0], [0], [1], [0, 0, 1, 1], [], []>} : vector<8x16xbf16>, vector<16x128xbf16>, vector<8x128xf32> -> vector<8x128xf32>
    %23 = vector.broadcast %3 : vector<8x1xf32> to vector<8x128xf32>
    %24 = arith.addf %22, %23 : vector<8x128xf32>
    %cst_13 = arith.constant 0.000000e+00 : f32
    %25 = vector.broadcast %cst_13 : f32 to vector<8x128xf32>
    %26 = arith.maximumf %24, %25 : vector<8x128xf32>
    %c0_14 = arith.constant 0 : index
    %c0_15 = arith.constant 0 : index
    %27 = vector.load %arg6[%c0_14, %c0_15] : memref<8x4xbf16, #tpu.memory_space<vmem>>, vector<8x4xbf16>
    %cst_16 = arith.constant dense<0.000000e+00> : vector<8x128xf32>
    %28 = tpu.matmul %27, %1, %cst_16 {dimension_numbers = #tpu.dot_dimension_numbers<[1], [0], [0], [1], [0, 0, 1, 1], [], []>} : vector<8x4xbf16>, vector<4x128xbf16>, vector<8x128xf32> -> vector<8x128xf32>
    %c0_17 = arith.constant 0 : index
    %c2 = arith.constant 2 : index
    %29 = vector.load %arg4[%c0_17, %c2] : memref<8x3xf32, #tpu.memory_space<vmem>>, vector<8x1xf32>
    %30 = vector.broadcast %29 : vector<8x1xf32> to vector<8x128xf32>
    %31 = arith.addf %28, %30 : vector<8x128xf32>
    %32 = arith.addf %26, %31 : vector<8x128xf32>
    %cst_18 = arith.constant 0.000000e+00 : f32
    %33 = vector.broadcast %cst_18 : f32 to vector<8x128xf32>
    %34 = arith.maximumf %32, %33 : vector<8x128xf32>
    %35 = arith.truncf %34 : vector<8x128xf32> to vector<8x128xbf16>
    %c0_19 = arith.constant 0 : index
    %c0_20 = arith.constant 0 : index
    %36 = vector.load %arg8[%c0_19, %c0_20] : memref<8x3xf32, #tpu.memory_space<vmem>>, vector<8x1xf32>
    %c0_21 = arith.constant 0 : index
    %c1_22 = arith.constant 1 : index
    %37 = vector.load %arg8[%c0_21, %c1_22] : memref<8x3xf32, #tpu.memory_space<vmem>>, vector<8x1xf32>
    %cst_23 = arith.constant 0.000000e+00 : bf16
    %38 = vector.broadcast %cst_23 : bf16 to vector<8x2xbf16>
    %39 = tpu.concatenate %38, %35 in 1 : vector<8x2xbf16>, vector<8x128xbf16> -> vector<8x130xbf16>
    %40 = vector.extract_strided_slice %39 {offsets = [0, 0], sizes = [8, 128], strides = [1, 1]} : vector<8x130xbf16> to vector<8x128xbf16>
    %41 = vector.extract_strided_slice %39 {offsets = [0, 2], sizes = [8, 128], strides = [1, 1]} : vector<8x130xbf16> to vector<8x128xbf16>
    %42 = tpu.concatenate %40, %41 in 0 : vector<8x128xbf16>, vector<8x128xbf16> -> vector<16x128xbf16>
    %c0_24 = arith.constant 0 : index
    %c0_25 = arith.constant 0 : index
    %43 = vector.load %arg7[%c0_24, %c0_25] : memref<8x16xbf16, #tpu.memory_space<vmem>>, vector<8x16xbf16>
    %cst_26 = arith.constant dense<0.000000e+00> : vector<8x128xf32>
    %44 = tpu.matmul %43, %42, %cst_26 {dimension_numbers = #tpu.dot_dimension_numbers<[1], [0], [0], [1], [0, 0, 1, 1], [], []>} : vector<8x16xbf16>, vector<16x128xbf16>, vector<8x128xf32> -> vector<8x128xf32>
    %45 = vector.broadcast %36 : vector<8x1xf32> to vector<8x128xf32>
    %46 = arith.addf %44, %45 : vector<8x128xf32>
    %cst_27 = arith.constant 0.000000e+00 : f32
    %47 = vector.broadcast %cst_27 : f32 to vector<8x128xf32>
    %48 = arith.maximumf %46, %47 : vector<8x128xf32>
    %49 = arith.truncf %48 : vector<8x128xf32> to vector<8x128xbf16>
    %cst_28 = arith.constant 0.000000e+00 : bf16
    %50 = vector.broadcast %cst_28 : bf16 to vector<8x2xbf16>
    %51 = tpu.concatenate %50, %49 in 1 : vector<8x2xbf16>, vector<8x128xbf16> -> vector<8x130xbf16>
    %52 = vector.extract_strided_slice %51 {offsets = [0, 0], sizes = [8, 128], strides = [1, 1]} : vector<8x130xbf16> to vector<8x128xbf16>
    %53 = vector.extract_strided_slice %51 {offsets = [0, 2], sizes = [8, 128], strides = [1, 1]} : vector<8x130xbf16> to vector<8x128xbf16>
    %54 = tpu.concatenate %52, %53 in 0 : vector<8x128xbf16>, vector<8x128xbf16> -> vector<16x128xbf16>
    %c0_29 = arith.constant 0 : index
    %c0_30 = arith.constant 0 : index
    %55 = vector.load %arg9[%c0_29, %c0_30] : memref<8x16xbf16, #tpu.memory_space<vmem>>, vector<8x16xbf16>
    %cst_31 = arith.constant dense<0.000000e+00> : vector<8x128xf32>
    %56 = tpu.matmul %55, %54, %cst_31 {dimension_numbers = #tpu.dot_dimension_numbers<[1], [0], [0], [1], [0, 0, 1, 1], [], []>} : vector<8x16xbf16>, vector<16x128xbf16>, vector<8x128xf32> -> vector<8x128xf32>
    %57 = vector.broadcast %37 : vector<8x1xf32> to vector<8x128xf32>
    %58 = arith.addf %56, %57 : vector<8x128xf32>
    %cst_32 = arith.constant 0.000000e+00 : f32
    %59 = vector.broadcast %cst_32 : f32 to vector<8x128xf32>
    %60 = arith.maximumf %58, %59 : vector<8x128xf32>
    %61 = arith.extf %35 : vector<8x128xbf16> to vector<8x128xf32>
    %62 = arith.addf %60, %61 : vector<8x128xf32>
    %cst_33 = arith.constant 0.000000e+00 : f32
    %63 = vector.broadcast %cst_33 : f32 to vector<8x128xf32>
    %64 = arith.maximumf %62, %63 : vector<8x128xf32>
    %65 = arith.truncf %64 : vector<8x128xf32> to vector<8x128xbf16>
    %c0_34 = arith.constant 0 : index
    %c0_35 = arith.constant 0 : index
    %c0_36 = arith.constant 0 : index
    %66 = vector.load %arg10[%c0_34, %c0_35, %c0_36] : memref<1x8x128xbf16, #tpu.memory_space<vmem>>, vector<1x8x128xbf16>
    %67 = vector.shape_cast %66 : vector<1x8x128xbf16> to vector<8x128xbf16>
    %68 = vector.shape_cast %65 : vector<8x128xbf16> to vector<1x8x128xbf16>
    tpu.vector_store %arg10[%c0_34, %c0_35, %c0_36], %68 {strides = array<i32>} : memref<1x8x128xbf16, #tpu.memory_space<vmem>>, vector<1x8x128xbf16>,
    return
  }
  func.func @transform_0(%arg0: i32, %arg1: i32) -> (i32, i32, i32) {
    %c0_i32 = arith.constant 0 : i32
    %c0_i32_0 = arith.constant 0 : i32
    return %arg0, %c0_i32, %arg1 : i32, i32, i32
  }
  func.func @transform_1(%arg0: i32, %arg1: i32) -> (i32, i32) {
    %c0_i32 = arith.constant 0 : i32
    %c0_i32_0 = arith.constant 0 : i32
    %c0_i32_1 = arith.constant 0 : i32
    return %c0_i32, %c0_i32_0 : i32, i32
  }
  func.func @transform_2(%arg0: i32, %arg1: i32) -> (i32, i32) {
    %c0_i32 = arith.constant 0 : i32
    %c0_i32_0 = arith.constant 0 : i32
    %c0_i32_1 = arith.constant 0 : i32
    return %c0_i32, %c0_i32_0 : i32, i32
  }
  func.func @transform_3(%arg0: i32, %arg1: i32) -> (i32, i32) {
    %c0_i32 = arith.constant 0 : i32
    %c0_i32_0 = arith.constant 0 : i32
    %c0_i32_1 = arith.constant 0 : i32
    return %c0_i32, %c0_i32_0 : i32, i32
  }
  func.func @transform_4(%arg0: i32, %arg1: i32) -> (i32, i32) {
    %c0_i32 = arith.constant 0 : i32
    %c0_i32_0 = arith.constant 0 : i32
    %c0_i32_1 = arith.constant 0 : i32
    return %c0_i32, %c0_i32_0 : i32, i32
  }
  func.func @transform_5(%arg0: i32, %arg1: i32) -> (i32, i32) {
    %c0_i32 = arith.constant 0 : i32
    %c0_i32_0 = arith.constant 0 : i32
    %c0_i32_1 = arith.constant 0 : i32
    return %c0_i32, %c0_i32_0 : i32, i32
  }
  func.func @transform_6(%arg0: i32, %arg1: i32) -> (i32, i32) {
    %c0_i32 = arith.constant 0 : i32
    %c0_i32_0 = arith.constant 0 : i32
    %c0_i32_1 = arith.constant 0 : i32
    return %c0_i32, %c0_i32_0 : i32, i32
  }
  func.func @transform_7(%arg0: i32, %arg1: i32) -> (i32, i32) {
    %c0_i32 = arith.constant 0 : i32
    %c0_i32_0 = arith.constant 0 : i32
    %c0_i32_1 = arith.constant 0 : i32
    return %c0_i32, %c0_i32_0 : i32, i32
  }
  func.func @transform_8(%arg0: i32, %arg1: i32) -> (i32, i32, i32) {
    %c0_i32 = arith.constant 0 : i32
    %c0_i32_0 = arith.constant 0 : i32
    return %arg0, %c0_i32, %arg1 : i32, i32, i32
  }
}

</mosaic_0001>

<bundles_post_ra>
// kernel: tpu_custom_call.1
= control target key start
LH: loop header
LB: loop body
LE: loop exit
PB: predicated region body
PF: predicated region fallthrough
CT: control target
= control target key end

     0   :  { %13 = vsyncpa [#allocation3], 0  ;;  %s1193_s0 = inlined_call_operand.vmem [shape: bf16[2,4,128], index: 0, kind: input, shape index: {}]   ;;  %s1194_s1 = inlined_call_operand.vmem [shape: bf16[8,8], index: 1, kind: input, shape index: {}]   ;;  %s1195_s2 = inlined_call_operand.vmem [shape: f32[8,3], index: 2, kind: input, shape index: {}]   ;;  %s1196_s3 = inlined_call_operand.vmem [shape: bf16[8,16], index: 3, kind: input, shape index: {}]   ;;  %s1197_s4 = inlined_call_operand.vmem [shape: bf16[8,4], index: 4, kind: input, shape index: {}]   ;;  %s1198_s5 = inlined_call_operand.vmem [shape: bf16[8,16], index: 5, kind: input, shape index: {}]   ;;  %s1199_s6 = inlined_call_operand.vmem [shape: f32[8,3], index: 6, kind: input, shape index: {}]   ;;  %s1200_s7 = inlined_call_operand.vmem [shape: bf16[8,16], index: 7, kind: input, shape index: {}]   ;;  %s1201_s8 = inlined_call_operand.hbm [shape: bf16[2,8,128], index: 8, kind: output, shape index: {}]  }
   0x1   :  { %15 = vsyncpa [#allocation3 + $0x1], 0  ;;  %s1022_s27 = smov 0   ;;  %s1024_s28 = smov 0  }
   0x2   :  { %s1026_s29 = smov 0   ;;  %s1028_s30 = smov 0  }
   0x3   :  { %s1030_s9 = smov 0   ;;  %s1032_s10 = smov 0  }
   0x4 LB: > { %s759_s11 = sadd.s32 4294967295, %s964_s10   ;;  %s760_s12 = sadd.s32 4294967294, %s964_s10   ;;  %s964_s10 = sphi %s1032_s10, %s21_s10   ;;  %s960_s9 = sphi %s1030_s9, %s1208_s9   ;;  %s956_s30 = sphi %s1028_s30, %s1207_s30   ;;  %s952_s29 = sphi %s1026_s29, %s1206_s29   ;;  %s948_s28 = sphi %s1024_s28, %s1205_s28   ;;  %s944_s27 = sphi %s1022_s27, %s1204_s27  }
   0x5   : > { %s33_s13 = sadd.s32 1, %s960_s9  ;;  %s217_s14 = sadd.s32 1, %s952_s29 }
   0x6   : > { %p35_p0 = scmp.ge.s32.totalorder %s33_s13, 2  ;;  %p227_p1 = scmp.ne.s32.totalorder %s952_s29, %s948_s28 }
   0x7   : > { %p228_p2 = scmp.eq.s32.totalorder %s759_s11, 1  ;;  %p233_p3 = scmp.ne.s32.totalorder %s948_s28, %s944_s27 }
   0x8   : > { %s1210_s13 = smov (%p35_p0, %s33_s13), 0  ;;  %p234_p5 = scmp.eq.s32.totalorder %s760_s12, 1 }
   0x9   : > { %p1062_p4 = por %p228_p2, %p227_p1  ;;  %s212_s16 = ssub.s32 %s960_s9, %s1210_s13 }
   0xa   : > { %p763_p6 = scmp.ge.s32.totalorder %s964_s10, 1  ;;  %p215_p7 = scmp.eq.s32.totalorder %s212_s16, 0 }
   0xb   : > { %p1069_p8 = por %p234_p5, %p233_p3  ;;  %p283_p9 = scmp.lt.s32.totalorder %s964_s10, 3 }
   0xc   : > { %s1075_s18 = scalar_select %p215_p7, %s952_s29, %s217_s14  }
   0xd   : > { %p284_p10 = pnand %p763_p6, %p283_p9 }
   0xe   : > { %p319_p11 = scmp.lt.s32.totalorder (!%p284_p10), %s956_s30, 1  ;;  %v333_v0 = vlaneseq (!%p284_p10)  ;;  %v966_v1 = vmov (!%p284_p10), 1983009808   ;;  %s967_s24 = smov (!%p284_p10), 1   ;;  %v968_v8 = vmov (!%p284_p10), 0.0   ;;  %vm969_vm0 = vmmov (!%p284_p10), 0  }
   0xf   : > { %287 = sbr.rel (%p284_p10) target bundleno = 1876 (0x754), region = 52  ;;  %v331_v2 = vunpack.c.l.s4 (!%p284_p10), %v966_v1  ;;  %785 = vmatprep.subr.bf16.mxu0 (!%p284_p10), %v968_v8  ;;  %791 = vmatprep.subr.bf16.mxu1 (!%p284_p10), %v968_v8  ;;  %vm339_vm1 = vcmask (!%p284_p10), 7168   ;;  %v970_v9 = vmov (!%p284_p10), 0   ;;  %s971_s25 = smov (!%p284_p10), 127   ;;  %v328_v14 = vld [vmem:[%s1195_s2] sm:$0xff] (!%p284_p10)  ;;  %vm350_vm2 = vcmask (!%p284_p10), 1039360  }
  0x10   : > { %v334_v3 = vshrl.u32 (!%p284_p10), %v333_v0, 7  ;;  %787 = vmatprep.mubr.msk.bf16.mxu0 (!%p284_p10), %vm969_vm0, %v968_v8  ;;  %793 = vmatprep.mubr.msk.bf16.mxu1 (!%p284_p10), %vm969_vm0, %v968_v8  ;;  %vm352_vm3 = vcmask (!%p284_p10), 1041408   ;;  %vm365_vm4 = vcmask (!%p284_p10), 1043456   ;;  %v355_v20 = vld [vmem:[%s1194_s1] sm:$0xf] (!%p284_p10)  ;;  %vm361_vm5 = vcmask (!%p284_p10), 64512  }
  0x11   : > { %v332_v4 = vunpack.c.0.s8 (!%p284_p10), %v331_v2  ;;  %880 = vset.pattern.permute.xlu1 (!%p284_p10), %v970_v9  ;;  %v476_v30 = vld [vmem:[%s1197_s4] sm:$0xf] (!%p284_p10)  ;;  %vm483_vm6 = vcmask (!%p284_p10), 31744   ;;  %v972_v31 = vmov (!%p284_p10), 1   ;;  %v973_v32 = vmov (!%p284_p10), 2   ;;  %s974_s22 = smov (!%p284_p10), 2  }
  0x12   : > { %882 = vset.pattern.permute.xlu0 (!%p284_p10), %v973_v32  ;;  %v426_v41 = vld [vmem:[%s1196_s3] sm:$0xf] (!%p284_p10)  ;;  %vm431_vm7 = vcmask (!%p284_p10), 130048   ;;  %vm537_vm8 = vcmask (!%p284_p10), 15360   ;;  %vm547_vm9 = vcmask (!%p284_p10), 1031168   ;;  %s316_s16 = sand.u32 (!%p284_p10), 1, %s948_s28  }
  0x13   : > { %v335_v5 = vsub.s32 (!%p284_p10), %v332_v4, %v334_v3  ;;  %v533_v62 = vld [vmem:[%s1199_s6] sm:$0xff] (!%p284_p10)  ;;  %s674_s26 = scalar_lea.sflag (!%p284_p10), [#allocation3], %s316_s16 }
  0x14   : > { %v552_v3 = vld [vmem:[%s1198_s5] sm:$0xf] (!%p284_p10) }
  0x16   : > { %s320_s19 = scalar_select %p319_p11, %s956_s30, 1 }
  0x18   : > { %s765_s20 = sshll.u32 %s320_s19, 1  ;;  %s764_s19 = sshll.u32 %s316_s16, 2 }
  0x19   : > { %s325_s23 = scalar_lea.vmem %s1193_s0, %s765_s20  ;;  %s772_s20 = sshll.u32 %s956_s30, 6 }
  0x1a   : > { %v327_v6 = vld [vmem:[%s325_s23] sm:$0x3]  ;;  %s975_s23 = smov 126   ;;  %s318_s21 = scalar_lea.vmem [#allocation2], %s764_s19 }
  0x1b   : > { %v336_v7 = vrot.slane %v327_v6, %v335_v5  ;;  %v488_v29 = vsel %vm352_vm3, %v327_v6, 0  ;;  %s976_s30 = smov [#allocation2]  }
  0x1c   : > { %s890_s12 = sshll.u32 %s976_s30, 4  ;;  %s891_s12 = int_to_ptr.vmem [resolvable:$false] %s890_s12 }
  0x1d   : > { %337 = vrot.lane.b32.xlu0 %v336_v7, %s967_s24  ;;  %s892_s14 = scalar_lea.vmem %s891_s12, 128 }
  0x8f   : > { %v338_v10 = vpop.permute.xlu0 %337 }
  0x90   : > { %v342_v11 = vsel %vm339_vm1, 0, %v338_v10  ;;  %v345_v12 = vrot.slane %v338_v10, 6 }
  0x91   : > { %v344_v13 = vrot.slane %v342_v11, 6 }
  0x92   : > { %348 = vrot.lane.b32.xlu1 %v345_v12, %s971_s25 }
  0x93   : > { %346 = vrot.lane.b32.xlu0 %v344_v13, %s971_s25 }
  0x96   : > { %358 = vperm.xlu1 %880, %v328_v14  }
  0x9a   : > { %881 = vset.pattern.permute.xlu1 %v972_v31 }
 0x104   : > { %v349_v15 = vpop.permute.xlu1 %348 }
 0x105   : > { %v347_v16 = vpop.permute.xlu0 %346 }
 0x106   : > { %v351_v17 = vsel %vm350_vm2, %v347_v16, %v349_v15 }
 0x107   : > { %v354_v18 = vsel %vm352_vm3, %v342_v11, %v351_v17 }
 0x108   : > { %v366_v19 = vsel %vm365_vm4, %v354_v18, 0 }
 0x109   : > { %786 = vmatpush3.bf16.msra.mxu0 %v366_v19 }
 0x10a   : > { %797 = vmatprep.subr.bf16.mxu0 %v968_v8 }
 0x10c   : > { %788 = vmatmul.mubr.msk.bf16.vlgmr.msra.gmra.mrb[0].mxu0 %vm361_vm5, %v355_v20  ;;  %v619_v20 = vld [vmem:[%s1200_s7] sm:$0xf] }
 0x10d   : > { %799 = vmatprep.mubr.msk.bf16.mxu0 %vm969_vm0, %v968_v8  ;;  %798 = vmatpush3.bf16.msra.mxu0 %v488_v29 }
 0x10e   : > { %809 = vmatprep.subr.bf16.mxu0 %v968_v8 }
 0x114   : > { %800 = vmatmul.mubr.msk.bf16.vlgmr.msra.gmra.mrb[4].mxu0 %vm483_vm6, %v476_v30 }
 0x115   : > { %v359_v21 = vpop.permute.xlu1 %358  ;;  %811 = vmatprep.mubr.msk.bf16.mxu0 %vm969_vm0, %v968_v8 }
 0x1df   : > { %v402_v22 = vpop.f32.mrb[0].mxu0 }
 0x1e0   : > { %v403_v23 = vadd.f32 %v402_v22, %v359_v21  ;;  %v789_v24 = vpop.f32.mrb[1].mxu0 }
 0x1e1   : > { %v405_v25 = vpop.f32.mrb[2].mxu0 }
 0x1e2   : > { %v408_v26 = vmax.f32 %v403_v23, 0.0  ;;  %v790_v27 = vpop.f32.mrb[3].mxu0 }
 0x1e4   : > { %v409_v28 = vpack.c.bf16 %v408_v26, %v408_v26 }
 0x1e6   : > { %411 = vrot.lane.b32.xlu0 %v409_v28, %s967_s24 }
 0x1e7   : > { %v524_v42 = vpop.f32.mrb[4].mxu0 }
 0x1e8   : > { %v801_v43 = vpop.f32.mrb[5].mxu0 }
 0x1e9   : > { %v527_v44 = vpop.f32.mrb[6].mxu0 }
 0x1ea   : > { %v802_v45 = vpop.f32.mrb[7].mxu0 }
 0x258   : > { %v412_v33 = vpop.permute.xlu0 %411 }
 0x259   : > { %v414_v34 = vsel %vm339_vm1, 0, %v412_v33  ;;  %v417_v35 = vrot.slane %v412_v33, 4 }
 0x25a   : > { %v416_v36 = vrot.slane %v414_v34, 4 }
 0x25b   : > { %420 = vrot.lane.b32.xlu0 %v417_v35, %s971_s25 }
 0x25c   : > { %418 = vrot.lane.b32.xlu1 %v416_v36, %s971_s25  ;;  %s1146_s25 = scalar_lea.hbm %s1201_s8, %s772_s20 }
 0x25f   : > { %480 = vperm.xlu0 %882, %v328_v14  }
 0x260   : > { %428 = vperm.xlu1 %881, %v328_v14  }
 0x263   : > { %885 = vset.pattern.permute.xlu0 %v972_v31 }
 0x264   : > { %883 = vset.pattern.permute.xlu1 %v970_v9 }
 0x2cd   : > { %v421_v37 = vpop.permute.xlu0 %420 }
 0x2ce   : > { %v419_v38 = vpop.permute.xlu1 %418 }
 0x2cf   : > { %v422_v39 = vsel %vm350_vm2, %v419_v38, %v421_v37 }
 0x2d0   : > { %v424_v40 = vsel %vm365_vm4, %v414_v34, %v422_v39 }
 0x2d1   : > { %792 = vmatpush3.bf16.msra.mxu1 %v424_v40 }
 0x2d2   : > { %803 = vmatprep.subr.bf16.mxu1 %v968_v8 }
 0x2d4   : > { %794 = vmatmul.mubr.msk.bf16.vlgmr.msra.gmra.mrb[0].mxu1 %vm431_vm7, %v426_v41 }
 0x2d5   : > { %805 = vmatprep.mubr.msk.bf16.mxu1 %vm969_vm0, %v968_v8 }
 0x2de   : > { %v481_v47 = vpop.permute.xlu0 %480 }
 0x2df   : > { %v429_v46 = vpop.permute.xlu1 %428  ;;  %v525_v51 = vadd.f32 %v524_v42, %v481_v47 }
 0x3a7   : > { %v469_v48 = vpop.f32.mrb[0].mxu1 }
 0x3a8   : > { %v470_v49 = vadd.f32 %v469_v48, %v429_v46  ;;  %v795_v50 = vpop.f32.mrb[1].mxu1 }
 0x3a9   : > { %v472_v52 = vpop.f32.mrb[2].mxu1 }
 0x3aa   : > { %v475_v53 = vmax.f32 %v470_v49, 0.0  ;;  %v796_v54 = vpop.f32.mrb[3].mxu1 }
 0x3ac   : > { %v530_v55 = vadd.f32 %v525_v51, %v475_v53 }
 0x3ae   : > { %v531_v56 = vmax.f32 %v530_v55, 0.0 }
 0x3b0   : > { %v532_v57 = vpack.c.bf16 %v531_v56, %v531_v56 }
 0x3b2   : > { %535 = vrot.lane.b32.xlu1 %v532_v57, %s974_s22  ;;  %v668_v27 = vunpack.c.l.bf16 %v532_v57 }
 0x424   : > { %v536_v58 = vpop.permute.xlu1 %535 }
 0x425   : > { %v539_v59 = vsel %vm537_vm8, 0, %v536_v58  ;;  %v542_v60 = vrot.slane %v536_v58, 4 }
 0x426   : > { %v541_v61 = vrot.slane %v539_v59, 4 }
 0x427   : > { %545 = vrot.lane.b32.xlu0 %v542_v60, %s975_s23 }
 0x428   : > { %543 = vrot.lane.b32.xlu1 %v541_v61, %s975_s23 }
 0x42c   : > { %555 = vperm.xlu1 %883, %v533_v62  }
 0x430   : > { %884 = vset.pattern.permute.xlu1 %v972_v31 }
 0x499   : > { %v546_v63 = vpop.permute.xlu0 %545 }
 0x49a   : > { %v544_v0 = vpop.permute.xlu1 %543 }
 0x49b   : > { %v548_v1 = vsel %vm547_vm9, %v544_v0, %v546_v63 }
 0x49c   : > { %v550_v2 = vsel %vm365_vm4, %v539_v59, %v548_v1 }
 0x49d   : > { %804 = vmatpush3.bf16.msra.mxu1 %v550_v2 }
 0x4a0   : > { %806 = vmatmul.mubr.msk.bf16.vlgmr.msra.gmra.mrb[4].mxu1 %vm431_vm7, %v552_v3 }
 0x4ab   : > { %v556_v4 = vpop.permute.xlu1 %555 }
 0x573   : > { %v595_v5 = vpop.f32.mrb[4].mxu1 }
 0x574   : > { %v596_v6 = vadd.f32 %v595_v5, %v556_v4  ;;  %v807_v7 = vpop.f32.mrb[5].mxu1 }
 0x575   : > { %v598_v8 = vpop.f32.mrb[6].mxu1 }
 0x576   : > { %v601_v9 = vmax.f32 %v596_v6, 0.0  ;;  %v808_v10 = vpop.f32.mrb[7].mxu1 }
 0x578   : > { %v602_v11 = vpack.c.bf16 %v601_v9, %v601_v9 }
 0x57a   : > { %604 = vrot.lane.b32.xlu0 %v602_v11, %s974_s22  ;;  %s688_s22 = sshll.u32 %s318_s21, 4  ;;  %s1148_s22 = int_to_ptr.vmem [resolvable:$true] %s688_s22 }
 0x57b   : > { %s886_s11 = scalar_lea.vmem %s1148_s22, 64  ;;  %p893_p1 = scmp.lt.s32.totalorder %s1148_s22, %s891_s12 }
 0x57c   : > { %p887_p12 = scmp.ne.s32.totalorder %s1148_s22, %s886_s11  ;;  %p894_p2 = scmp.lt.s32.totalorder %s892_s14, %s886_s11 }
 0x57e   : > { %p888_p13 = pnand %p887_p12, %p1062_p4  ;;  %p895_p3 = por %p894_p2, %p893_p1 }
 0x580   : > { %p889_p0 = pneg %p888_p13 }
 0x582   : > { %p896_p5 = pnand %p895_p3, %p889_p0 }
 0x5ec   : > { %v605_v12 = vpop.permute.xlu0 %604 }
 0x5ed   : > { %v607_v13 = vsel %vm537_vm8, 0, %v605_v12  ;;  %v610_v14 = vrot.slane %v605_v12, 4 }
 0x5ee   : > { %v609_v15 = vrot.slane %v607_v13, 4 }
 0x5ef   : > { %613 = vrot.lane.b32.xlu0 %v610_v14, %s975_s23 }
 0x5f0   : > { %611 = vrot.lane.b32.xlu1 %v609_v15, %s975_s23 }
 0x5f4   : > { %621 = vperm.xlu1 %884, %v533_v62  }
 0x661   : > { %v614_v16 = vpop.permute.xlu0 %613 }
 0x662   : > { %v612_v17 = vpop.permute.xlu1 %611 }
 0x663   : > { %v615_v18 = vsel %vm547_vm9, %v612_v17, %v614_v16 }
 0x664   : > { %v617_v19 = vsel %vm365_vm4, %v607_v13, %v615_v18 }
 0x665   : > { %810 = vmatpush3.bf16.msra.mxu0 %v617_v19 }
 0x668   : > { %812 = vmatmul.mubr.msk.bf16.vlgmr.msra.gmra.mrb[8].mxu0 %vm431_vm7, %v619_v20 }
 0x673   : > { %v622_v21 = vpop.permute.xlu1 %621 }
 0x73b   : > { %v661_v22 = vpop.f32.mrb[8].mxu0 }
 0x73c   : > { %v662_v23 = vadd.f32 %v661_v22, %v622_v21  ;;  %v813_v24 = vpop.f32.mrb[9].mxu0 }
 0x73d   : > { %v664_v25 = vpop.f32.mrb[10].mxu0 }
 0x73e   : > { %v667_v26 = vmax.f32 %v662_v23, 0.0  ;;  %v814_v28 = vpop.f32.mrb[11].mxu0 }
 0x740   : > { %v669_v29 = vadd.f32 %v668_v27, %v667_v26 }
 0x742   : > { %v670_v30 = vmax.f32 %v669_v29, 0.0 }
 0x744   : > { %v671_v31 = vpack.c.bf16 %v670_v30, %v670_v30 }
 0x746   : > { %672 = vst [vmem:[%s318_s21] sm:$0xf] %v671_v31 }
 0x747   : > { %899 = shalt.err (!%p896_p5)
}
 0x748   : > { %s900_s16 = scalar_lea.hbm %s1146_s25, 64  ;;  %s904_s21 = scalar_lea.hbm %s1201_s8, 128 }
 0x749   : > { %p901_p6 = scmp.ne.s32.totalorder %s1146_s25, %s900_s16  ;;  %p905_p10 = scmp.lt.u32.totalorder %s1146_s25, %s1201_s8 }
 0x74a   : > { %p906_p11 = scmp.lt.u32.totalorder %s904_s21, %s900_s16  ;;  %p908_p13 = scmp.lt.u32.totalorder %s900_s16, %s1146_s25 }
 0x74b   : > { %p902_p7 = pnand %p901_p6, %p1062_p4 }
 0x74c   : > { %p907_p12 = por %p906_p11, %p905_p10 }
 0x74d   : > { %p903_p9 = pneg %p902_p7 }
 0x74e   : > { %p909_p0 = por %p908_p13, %p907_p12 }
 0x750   : > { %p910_p1 = pnand %p909_p0, %p903_p9 }
 0x752   : > { %913 = shalt.err (!%p910_p1)
}
 0x753   : > { %815 = dma.vmem_to_hbm [thread:$0]  (%p1062_p4), %s1148_s22, 64, %s1146_s25, %s674_s26  }
 0x754 PF: > { %p821_p2 = scmp.ge.s32.totalorder %s964_s10, 2  ;;  %s700_s11 = sand.u32 1, %s944_s27  }
 0x755   : > { %s701_s30 = scalar_lea.sflag [#allocation3], %s700_s11 }
 0x756   : > { %p818_p3 = pnand %p821_p2, %p1069_p8 }
 0x758   : > { %939 = dma.done.wait (!%p818_p3), %s701_s30, 64  }
 0x759   : > { %941 = vsyncadd (!%p818_p3), %s701_s30, 4294967232  ;;  %s21_s10 = sadd.s32 1, %s964_s10   ;;  %s1204_s27 = smov %s948_s28 }
 0x75a   : > { %p18_p5 = scmp.ge.s32.totalorder %s21_s10, 4   ;;  %s1205_s28 = smov %s952_s29 }
 0x75b   : > { %s1206_s29 = smov %s1075_s18  ;;  %s1207_s30 = smov %s960_s9 }
 0x75c   : > { %s1208_s9 = smov %s1210_s13  ;;  %20 = sbr.rel (!%p18_p5) target bundleno = 4 (0x4), region = 87 }
 0x763   :  { %706 = vsyncpa [#allocation3], 1 }
 0x764   :  { %708 = vsyncpa [#allocation3 + $0x1], 1 }

</bundles_post_ra>
